<compile_context>
chip_gen: v5e
topology: v5e:2x2
jax: 0.10.0
libtpu: 0.0.40
codegen_flags: <defaults>
</compile_context>

<pallas_src>
import functools

import jax
import jax.numpy as jnp
from jax.experimental import pallas as pl
from jax.experimental.pallas import tpu as pltpu

_CHANNELS = [(3, 12), (12, 24), (24, 48)]   # (Cin, Cout) per conv layer


# ----------------------------------------------------------------------------
# One-time weight preprocessing (plain JAX, outside the per-call path).
# ----------------------------------------------------------------------------
def _banded_weight(w_oihw, wp, wo):
    """Conv weight (Cout,Cin,4,4) -> banded GEMM weights (4, wp*Cin, wo*Cout).

    Row index of BW_i : w_pad*Cin + ci      (w_pad = padded input column)
    Col index         : wo_out*Cout + co
    Entry             : W[co, ci, i, j] with j = w_pad - 2*wo_out, 0 <= j < 4.
    """
    cout, cin, kh, kw = w_oihw.shape
    wt = jnp.transpose(w_oihw, (2, 3, 1, 0))          # (kh, kw, cin, cout)
    wo_idx = jnp.arange(wo)
    mats = []
    for i in range(kh):
        m = jnp.zeros((wp, wo, cin, cout), wt.dtype)
        for j in range(kw):
            m = m.at[2 * wo_idx + j, wo_idx, :, :].set(wt[i, j][None])
        mats.append(jnp.transpose(m, (0, 2, 1, 3)).reshape(wp * cin, wo * cout))
    return jnp.stack(mats, axis=0)                    # (kh, wp*cin, wo*cout)


def prepare_encoder_params(params, h, w):
    """Build banded GEMM weights + lane-tiled biases (run once per model)."""
    prepped = []
    cur_w = w
    for wgt, bias in params:
        cout = wgt.shape[0]
        wo = cur_w // 2
        wp = cur_w + 2
        bw = _banded_weight(wgt, wp, wo)              # (4, wp*cin, wo*cout)
        tb = jnp.tile(bias, wo).reshape(1, wo * cout) # lane = wo*cout + co
        prepped.append((bw, tb))
        cur_w = wo
    return prepped


def _layer_dims(h, w, channels):
    dims = []
    cur_h, cur_w = h, w
    for cin, cout in channels:
        # Correctness relies on even spatial dims at every layer (stride 2).
        assert cur_h % 2 == 0 and cur_w % 2 == 0, (cur_h, cur_w)
        ho, wo = cur_h // 2, cur_w // 2
        dims.append(dict(hi=cur_h, wi=cur_w, cin=cin, cout=cout,
                         ho=ho, wo=wo, wp=cur_w + 2))
        cur_h, cur_w = ho, wo
    return dims


# ----------------------------------------------------------------------------
# Fused Pallas kernel (grid over batch blocks; default = whole batch, 1 step).
# ----------------------------------------------------------------------------
def _make_encoder_kernel(dims, bb):
    n_layers = len(dims)

    def kernel(*refs):
        x_ref = refs[0]
        w_refs = [refs[1 + 2 * l] for l in range(n_layers)]
        b_refs = [refs[2 + 2 * l] for l in range(n_layers)]
        o_ref = refs[1 + 2 * n_layers]
        buf_refs = list(refs[2 + 2 * n_layers:])   # padded buffers, layers 1..L-1

        y = None
        for l, d in enumerate(dims):
            ho, wo, cout = d["ho"], d["wo"], d["cout"]
            m = ho * bb                             # GEMM M = batch_block * Ho
            rpp = (d["hi"] // 2 + 1) * bb           # rows per parity in src

            # ---- 4 kernel-row taps -> 4 MXU GEMMs against banded weights ----
            acc = None
            for i in range(4):
                r0 = (i % 2) * rpp + (i // 2) * bb  # parity base + half-row off
                if l == 0:
                    tap = x_ref[0, r0:r0 + m, :]
                else:
                    tap = buf_refs[l - 1][r0:r0 + m, :]
                dmm = jnp.dot(tap, w_refs[l][i],
                              preferred_element_type=jnp.float32)
                acc = dmm if acc is None else acc + dmm
            y = jnp.maximum(acc + b_refs[l][...], 0.0)   # (m, wo*cout)

            # ---- Scatter into next layer's parity-split padded VMEM buffer ----
            if l + 1 < n_layers:
                nxt = buf_refs[l]
                hh = ho // 2                      # half-rows of data per batch
                rppn = (hh + 1) * bb              # rows per parity in `nxt`
                nw = wo * cout
                # Zero ONLY the pad borders, every grid step (megacore-safe):
                zcol = jnp.zeros((2 * rppn, cout), jnp.float32)
                nxt[:, 0:cout] = zcol                              # left pad
                nxt[:, (wo + 1) * cout:(wo + 2) * cout] = zcol     # right pad
                zrow = jnp.zeros((bb, (wo + 2) * cout), jnp.float32)
                nxt[0:bb, :] = zrow                                # top pad row
                nxt[rppn + hh * bb:rppn + (hh + 1) * bb, :] = zrow  # bottom pad
                # Even output rows -> parity 1, odd -> parity 0; one slab of
                # `bb` rows per output row (contiguous static slices).
                for q in range(hh):
                    nxt[rppn + q * bb:rppn + (q + 1) * bb, cout:cout + nw] = (
                        y[(2 * q) * bb:(2 * q + 1) * bb, :])
                    nxt[(q + 1) * bb:(q + 2) * bb, cout:cout + nw] = (
                        y[(2 * q + 1) * bb:(2 * q + 2) * bb, :])

        o_ref[0, :, :] = y.astype(o_ref.dtype)

    return kernel


@functools.partial(jax.jit, static_argnames=("batch_block",))
def encoder_forward(x_nchw, prepped, batch_block=None):
    n, c, h, w = x_nchw.shape
    # Default: whole batch in ONE grid step (best on single-TC v5e/v6e).
    # On v7x pass batch_block = n // 2 so the even grid feeds both TensorCores.
    bb = n if batch_block is None else batch_block
    assert n % bb == 0
    g = n // bb

    dims = _layer_dims(h, w, _CHANNELS)
    dl = dims[-1]
    ho_f, wo_f, cout_f = dl["ho"], dl["wo"], dl["cout"]
    kernel = _make_encoder_kernel(dims, bb)

    # Wrapper-side layout plumbing (tiny tensor): NCHW -> padded, parity-split,
    # batch-folded (g, 2*(hp//2)*bb, wp*C); sublane = parity*(hp//2)*bb +
    # half_row*bb + batch_in_block, lane = w_pad*C + c.
    hp, wp = h + 2, w + 2
    rows0 = 2 * (hp // 2) * bb
    xp = jnp.transpose(x_nchw, (0, 2, 3, 1))                    # NHWC
    xp = jnp.pad(xp, ((0, 0), (1, 1), (1, 1), (0, 0)))          # zero pad H, W
    xp = xp.reshape(g, bb, hp // 2, 2, wp * c)                  # [g, b, q, p, lane]
    xp = jnp.transpose(xp, (0, 3, 2, 1, 4)).reshape(g, rows0, wp * c)

    in_specs = [pl.BlockSpec((1, rows0, wp * c), lambda i: (i, 0, 0))]
    flat_args = [xp]
    for bw, tb in prepped:
        in_specs.append(pl.BlockSpec(bw.shape, lambda i: (0, 0, 0)))
        in_specs.append(pl.BlockSpec(tb.shape, lambda i: (0, 0)))
        flat_args.extend([bw, tb])

    # Parity-split padded activation buffers for layers 1..L-1 (VMEM-resident;
    # inter-layer activations never touch HBM).
    scratch = [pltpu.VMEM((2 * (d["hi"] // 2 + 1) * bb, d["wp"] * d["cin"]),
                          jnp.float32)
               for d in dims[1:]]

    flops = 2 * n * sum(d["ho"] * (4 * d["wp"] * d["cin"]) * (d["wo"] * d["cout"])
                        for d in dims)
    bytes_accessed = 4 * (int(xp.size)
                          + sum(int(a.size) for a in flat_args[1:])
                          + n * ho_f * wo_f * cout_f)

    out = pl.pallas_call(
        kernel,
        out_shape=jax.ShapeDtypeStruct((g, bb * ho_f, wo_f * cout_f),
                                       jnp.float32),
        grid=(g,),
        in_specs=in_specs,
        out_specs=pl.BlockSpec((1, bb * ho_f, wo_f * cout_f),
                               lambda i: (i, 0, 0)),
        scratch_shapes=scratch,
        compiler_params=pltpu.CompilerParams(
            dimension_semantics=("parallel",)),
        cost_estimate=pl.CostEstimate(flops=flops, transcendentals=0,
                                      bytes_accessed=bytes_accessed),
    )(*flat_args)

    # Un-fold: rows within a grid block are ordered (h_out, batch_in_block).
    out = out.reshape(g, ho_f, bb, wo_f, cout_f)
    out = jnp.transpose(out, (0, 2, 4, 1, 3)).reshape(n, cout_f, ho_f, wo_f)
    return out                                                   # NCHW


# ----------------------------------------------------------------------------
# Parameters + pure-JAX reference.
# ----------------------------------------------------------------------------
def init_encoder_params(key):
    """Deterministic synthetic weights; shapes match the nn.Conv2d layers."""
    shapes = [(co, ci, 4, 4) for ci, co in _CHANNELS]
    params = []
    for s in shapes:
        key, kw_, kb_ = jax.random.split(key, 3)
        fan_in = s[1] * s[2] * s[3]
        bound = 1.0 / jnp.sqrt(fan_in)
        wgt = jax.random.uniform(kw_, s, jnp.float32, -bound, bound)
        b = jax.random.uniform(kb_, (s[0],), jnp.float32, -bound, bound)
        params.append((wgt, b))
    return params


def encoder_reference(x_nchw, params):
    """Pure-JAX (XLA conv) reference for correctness checking."""
    out = x_nchw
    for wgt, b in params:
        out = jax.lax.conv_general_dilated(
            out, wgt, window_strides=(2, 2), padding=((1, 1), (1, 1)),
            dimension_numbers=("NCHW", "OIHW", "NCHW"))
        out = jax.nn.relu(out + b.reshape(1, -1, 1, 1))
    return out


if __name__ == "__main__":
    key = jax.random.PRNGKey(0)
    k_x, k_p = jax.random.split(key)

    # Shapes consistent with the module: (N=2, C=3, H=16, W=16).
    x = jax.random.normal(k_x, (2, 3, 16, 16), dtype=jnp.float32)
    params = init_encoder_params(k_p)
    prepped = prepare_encoder_params(params, h=16, w=16)   # one-time weight prep

    out = jax.block_until_ready(encoder_forward(x, prepped))
    assert out.shape == (2, 48, 2, 2), out.shape

    ref = jax.block_until_ready(encoder_reference(x, params))
    assert jnp.allclose(out, ref, rtol=1e-4, atol=1e-4), (
        float(jnp.max(jnp.abs(out - ref))))

    print("KERNEL_OK")
</pallas_src>

<mosaic_0001>
module attributes {stable_mosaic.version = 11 : i64} {
  func.func @kernel(%arg0: i32, %arg1: memref<1x36x54xf32, #tpu.memory_space<vmem>>, %arg2: memref<4x54x96xf32, #tpu.memory_space<vmem>>, %arg3: memref<1x96xf32, #tpu.memory_space<vmem>>, %arg4: memref<4x120x96xf32, #tpu.memory_space<vmem>>, %arg5: memref<1x96xf32, #tpu.memory_space<vmem>>, %arg6: memref<4x144x96xf32, #tpu.memory_space<vmem>>, %arg7: memref<1x96xf32, #tpu.memory_space<vmem>>, %arg8: memref<1x4x96xf32, #tpu.memory_space<vmem>>, %arg9: memref<20x120xf32, #tpu.memory_space<vmem>>, %arg10: memref<12x144xf32, #tpu.memory_space<vmem>>) attributes {dimension_semantics = [#tpu.dimension_semantics<parallel>], iteration_bounds = array<i64: 1>, scalar_prefetch = 0 : i64, scratch_operands = 2 : i64, tpu.core_type = #tpu.core_type<tc>, window_params = [{transform_indices = @transform_0, window_bounds = array<i64: 1, 36, 54>}, {pipeline_mode = #tpu.pipeline_mode<synchronous>, transform_indices = @transform_1, window_bounds = array<i64: 4, 54, 96>}, {pipeline_mode = #tpu.pipeline_mode<synchronous>, transform_indices = @transform_2, window_bounds = array<i64: 1, 96>}, {pipeline_mode = #tpu.pipeline_mode<synchronous>, transform_indices = @transform_3, window_bounds = array<i64: 4, 120, 96>}, {pipeline_mode = #tpu.pipeline_mode<synchronous>, transform_indices = @transform_4, window_bounds = array<i64: 1, 96>}, {pipeline_mode = #tpu.pipeline_mode<synchronous>, transform_indices = @transform_5, window_bounds = array<i64: 4, 144, 96>}, {pipeline_mode = #tpu.pipeline_mode<synchronous>, transform_indices = @transform_6, window_bounds = array<i64: 1, 96>}, {transform_indices = @transform_7, window_bounds = array<i64: 1, 4, 96>}]} {
    %c0 = arith.constant 0 : index
    %c0_0 = arith.constant 0 : index
    %c0_1 = arith.constant 0 : index
    %0 = vector.load %arg1[%c0, %c0_0, %c0_1] : memref<1x36x54xf32, #tpu.memory_space<vmem>>, vector<1x16x54xf32>
    %1 = vector.shape_cast %0 : vector<1x16x54xf32> to vector<16x54xf32>
    %c0_2 = arith.constant 0 : index
    %c0_3 = arith.constant 0 : index
    %c0_4 = arith.constant 0 : index
    %2 = vector.load %arg2[%c0_2, %c0_3, %c0_4] : memref<4x54x96xf32, #tpu.memory_space<vmem>>, vector<1x54x96xf32>
    %3 = vector.shape_cast %2 : vector<1x54x96xf32> to vector<54x96xf32>
    %cst = arith.constant dense<0.000000e+00> : vector<16x96xf32>
    %4 = tpu.matmul %1, %3, %cst {dimension_numbers = #tpu.dot_dimension_numbers<[1], [0], [0], [1], [0, 0, 1, 1], [], []>} : vector<16x54xf32>, vector<54x96xf32>, vector<16x96xf32> -> vector<16x96xf32>
    %c0_5 = arith.constant 0 : index
    %c18 = arith.constant 18 : index
    %c0_6 = arith.constant 0 : index
    %5 = vector.load %arg1[%c0_5, %c18, %c0_6] : memref<1x36x54xf32, #tpu.memory_space<vmem>>, vector<1x16x54xf32>
    %6 = vector.shape_cast %5 : vector<1x16x54xf32> to vector<16x54xf32>
    %c1 = arith.constant 1 : index
    %c0_7 = arith.constant 0 : index
    %c0_8 = arith.constant 0 : index
    %7 = vector.load %arg2[%c1, %c0_7, %c0_8] : memref<4x54x96xf32, #tpu.memory_space<vmem>>, vector<1x54x96xf32>
    %8 = vector.shape_cast %7 : vector<1x54x96xf32> to vector<54x96xf32>
    %cst_9 = arith.constant dense<0.000000e+00> : vector<16x96xf32>
    %9 = tpu.matmul %6, %8, %cst_9 {dimension_numbers = #tpu.dot_dimension_numbers<[1], [0], [0], [1], [0, 0, 1, 1], [], []>} : vector<16x54xf32>, vector<54x96xf32>, vector<16x96xf32> -> vector<16x96xf32>
    %10 = arith.addf %4, %9 : vector<16x96xf32>
    %c0_10 = arith.constant 0 : index
    %c2 = arith.constant 2 : index
    %c0_11 = arith.constant 0 : index
    %11 = vector.load %arg1[%c0_10, %c2, %c0_11] : memref<1x36x54xf32, #tpu.memory_space<vmem>>, vector<1x16x54xf32>
    %12 = vector.shape_cast %11 : vector<1x16x54xf32> to vector<16x54xf32>
    %c2_12 = arith.constant 2 : index
    %c0_13 = arith.constant 0 : index
    %c0_14 = arith.constant 0 : index
    %13 = vector.load %arg2[%c2_12, %c0_13, %c0_14] : memref<4x54x96xf32, #tpu.memory_space<vmem>>, vector<1x54x96xf32>
    %14 = vector.shape_cast %13 : vector<1x54x96xf32> to vector<54x96xf32>
    %cst_15 = arith.constant dense<0.000000e+00> : vector<16x96xf32>
    %15 = tpu.matmul %12, %14, %cst_15 {dimension_numbers = #tpu.dot_dimension_numbers<[1], [0], [0], [1], [0, 0, 1, 1], [], []>} : vector<16x54xf32>, vector<54x96xf32>, vector<16x96xf32> -> vector<16x96xf32>
    %16 = arith.addf %10, %15 : vector<16x96xf32>
    %c0_16 = arith.constant 0 : index
    %c20 = arith.constant 20 : index
    %c0_17 = arith.constant 0 : index
    %17 = vector.load %arg1[%c0_16, %c20, %c0_17] : memref<1x36x54xf32, #tpu.memory_space<vmem>>, vector<1x16x54xf32>
    %18 = vector.shape_cast %17 : vector<1x16x54xf32> to vector<16x54xf32>
    %c3 = arith.constant 3 : index
    %c0_18 = arith.constant 0 : index
    %c0_19 = arith.constant 0 : index
    %19 = vector.load %arg2[%c3, %c0_18, %c0_19] : memref<4x54x96xf32, #tpu.memory_space<vmem>>, vector<1x54x96xf32>
    %20 = vector.shape_cast %19 : vector<1x54x96xf32> to vector<54x96xf32>
    %cst_20 = arith.constant dense<0.000000e+00> : vector<16x96xf32>
    %21 = tpu.matmul %18, %20, %cst_20 {dimension_numbers = #tpu.dot_dimension_numbers<[1], [0], [0], [1], [0, 0, 1, 1], [], []>} : vector<16x54xf32>, vector<54x96xf32>, vector<16x96xf32> -> vector<16x96xf32>
    %22 = arith.addf %16, %21 : vector<16x96xf32>
    %c0_21 = arith.constant 0 : index
    %c0_22 = arith.constant 0 : index
    %23 = vector.load %arg3[%c0_21, %c0_22] : memref<1x96xf32, #tpu.memory_space<vmem>>, vector<1x96xf32>
    %24 = vector.broadcast %23 : vector<1x96xf32> to vector<16x96xf32>
    %25 = arith.addf %22, %24 : vector<16x96xf32>
    %cst_23 = arith.constant 0.000000e+00 : f32
    %26 = vector.broadcast %cst_23 : f32 to vector<16x96xf32>
    %27 = arith.maximumf %25, %26 : vector<16x96xf32>
    %cst_24 = arith.constant 0.000000e+00 : f32
    %28 = vector.broadcast %cst_24 : f32 to vector<20x12xf32>
    %c0_25 = arith.constant 0 : index
    %c0_26 = arith.constant 0 : index
    %29 = vector.load %arg9[%c0_25, %c0_26] : memref<20x120xf32, #tpu.memory_space<vmem>>, vector<20x12xf32>
    tpu.vector_store %arg9[%c0_25, %c0_26], %28 {strides = array<i32>} : memref<20x120xf32, #tpu.memory_space<vmem>>, vector<20x12xf32>,
    %c0_27 = arith.constant 0 : index
    %c108 = arith.constant 108 : index
    %30 = vector.load %arg9[%c0_27, %c108] : memref<20x120xf32, #tpu.memory_space<vmem>>, vector<20x12xf32>
    tpu.vector_store %arg9[%c0_27, %c108], %28 {strides = array<i32>} : memref<20x120xf32, #tpu.memory_space<vmem>>, vector<20x12xf32>,
    %cst_28 = arith.constant 0.000000e+00 : f32
    %31 = vector.broadcast %cst_28 : f32 to vector<2x120xf32>
    %c0_29 = arith.constant 0 : index
    %c0_30 = arith.constant 0 : index
    %32 = vector.load %arg9[%c0_29, %c0_30] : memref<20x120xf32, #tpu.memory_space<vmem>>, vector<2x120xf32>
    tpu.vector_store %arg9[%c0_29, %c0_30], %31 {strides = array<i32>} : memref<20x120xf32, #tpu.memory_space<vmem>>, vector<2x120xf32>,
    %c18_31 = arith.constant 18 : index
    %c0_32 = arith.constant 0 : index
    %33 = vector.load %arg9[%c18_31, %c0_32] : memref<20x120xf32, #tpu.memory_space<vmem>>, vector<2x120xf32>
    tpu.vector_store %arg9[%c18_31, %c0_32], %31 {strides = array<i32>} : memref<20x120xf32, #tpu.memory_space<vmem>>, vector<2x120xf32>,
    %34 = vector.extract_strided_slice %27 {offsets = [0, 0], sizes = [2, 96], strides = [1, 1]} : vector<16x96xf32> to vector<2x96xf32>
    %c10 = arith.constant 10 : index
    %c12 = arith.constant 12 : index
    %35 = vector.load %arg9[%c10, %c12] : memref<20x120xf32, #tpu.memory_space<vmem>>, vector<2x96xf32>
    tpu.vector_store %arg9[%c10, %c12], %34 {strides = array<i32>} : memref<20x120xf32, #tpu.memory_space<vmem>>, vector<2x96xf32>,
    %36 = vector.extract_strided_slice %27 {offsets = [2, 0], sizes = [2, 96], strides = [1, 1]} : vector<16x96xf32> to vector<2x96xf32>
    %c2_33 = arith.constant 2 : index
    %c12_34 = arith.constant 12 : index
    %37 = vector.load %arg9[%c2_33, %c12_34] : memref<20x120xf32, #tpu.memory_space<vmem>>, vector<2x96xf32>
    tpu.vector_store %arg9[%c2_33, %c12_34], %36 {strides = array<i32>} : memref<20x120xf32, #tpu.memory_space<vmem>>, vector<2x96xf32>,
    %38 = vector.extract_strided_slice %27 {offsets = [4, 0], sizes = [2, 96], strides = [1, 1]} : vector<16x96xf32> to vector<2x96xf32>
    %c12_35 = arith.constant 12 : index
    %c12_36 = arith.constant 12 : index
    %39 = vector.load %arg9[%c12_35, %c12_36] : memref<20x120xf32, #tpu.memory_space<vmem>>, vector<2x96xf32>
    tpu.vector_store %arg9[%c12_35, %c12_36], %38 {strides = array<i32>} : memref<20x120xf32, #tpu.memory_space<vmem>>, vector<2x96xf32>,
    %40 = vector.extract_strided_slice %27 {offsets = [6, 0], sizes = [2, 96], strides = [1, 1]} : vector<16x96xf32> to vector<2x96xf32>
    %c4 = arith.constant 4 : index
    %c12_37 = arith.constant 12 : index
    %41 = vector.load %arg9[%c4, %c12_37] : memref<20x120xf32, #tpu.memory_space<vmem>>, vector<2x96xf32>
    tpu.vector_store %arg9[%c4, %c12_37], %40 {strides = array<i32>} : memref<20x120xf32, #tpu.memory_space<vmem>>, vector<2x96xf32>,
    %42 = vector.extract_strided_slice %27 {offsets = [8, 0], sizes = [2, 96], strides = [1, 1]} : vector<16x96xf32> to vector<2x96xf32>
    %c14 = arith.constant 14 : index
    %c12_38 = arith.constant 12 : index
    %43 = vector.load %arg9[%c14, %c12_38] : memref<20x120xf32, #tpu.memory_space<vmem>>, vector<2x96xf32>
    tpu.vector_store %arg9[%c14, %c12_38], %42 {strides = array<i32>} : memref<20x120xf32, #tpu.memory_space<vmem>>, vector<2x96xf32>,
    %44 = vector.extract_strided_slice %27 {offsets = [10, 0], sizes = [2, 96], strides = [1, 1]} : vector<16x96xf32> to vector<2x96xf32>
    %c6 = arith.constant 6 : index
    %c12_39 = arith.constant 12 : index
    %45 = vector.load %arg9[%c6, %c12_39] : memref<20x120xf32, #tpu.memory_space<vmem>>, vector<2x96xf32>
    tpu.vector_store %arg9[%c6, %c12_39], %44 {strides = array<i32>} : memref<20x120xf32, #tpu.memory_space<vmem>>, vector<2x96xf32>,
    %46 = vector.extract_strided_slice %27 {offsets = [12, 0], sizes = [2, 96], strides = [1, 1]} : vector<16x96xf32> to vector<2x96xf32>
    %c16 = arith.constant 16 : index
    %c12_40 = arith.constant 12 : index
    %47 = vector.load %arg9[%c16, %c12_40] : memref<20x120xf32, #tpu.memory_space<vmem>>, vector<2x96xf32>
    tpu.vector_store %arg9[%c16, %c12_40], %46 {strides = array<i32>} : memref<20x120xf32, #tpu.memory_space<vmem>>, vector<2x96xf32>,
    %48 = vector.extract_strided_slice %27 {offsets = [14, 0], sizes = [2, 96], strides = [1, 1]} : vector<16x96xf32> to vector<2x96xf32>
    %c8 = arith.constant 8 : index
    %c12_41 = arith.constant 12 : index
    %49 = vector.load %arg9[%c8, %c12_41] : memref<20x120xf32, #tpu.memory_space<vmem>>, vector<2x96xf32>
    tpu.vector_store %arg9[%c8, %c12_41], %48 {strides = array<i32>} : memref<20x120xf32, #tpu.memory_space<vmem>>, vector<2x96xf32>,
    %c0_42 = arith.constant 0 : index
    %c0_43 = arith.constant 0 : index
    %50 = vector.load %arg9[%c0_42, %c0_43] : memref<20x120xf32, #tpu.memory_space<vmem>>, vector<8x120xf32>
    %c0_44 = arith.constant 0 : index
    %c0_45 = arith.constant 0 : index
    %c0_46 = arith.constant 0 : index
    %51 = vector.load %arg4[%c0_44, %c0_45, %c0_46] : memref<4x120x96xf32, #tpu.memory_space<vmem>>, vector<1x120x96xf32>
    %52 = vector.shape_cast %51 : vector<1x120x96xf32> to vector<120x96xf32>
    %cst_47 = arith.constant dense<0.000000e+00> : vector<8x96xf32>
    %53 = tpu.matmul %50, %52, %cst_47 {dimension_numbers = #tpu.dot_dimension_numbers<[1], [0], [0], [1], [0, 0, 1, 1], [], []>} : vector<8x120xf32>, vector<120x96xf32>, vector<8x96xf32> -> vector<8x96xf32>
    %c10_48 = arith.constant 10 : index
    %c0_49 = arith.constant 0 : index
    %54 = vector.load %arg9[%c10_48, %c0_49] : memref<20x120xf32, #tpu.memory_space<vmem>>, vector<8x120xf32>
    %c1_50 = arith.constant 1 : index
    %c0_51 = arith.constant 0 : index
    %c0_52 = arith.constant 0 : index
    %55 = vector.load %arg4[%c1_50, %c0_51, %c0_52] : memref<4x120x96xf32, #tpu.memory_space<vmem>>, vector<1x120x96xf32>
    %56 = vector.shape_cast %55 : vector<1x120x96xf32> to vector<120x96xf32>
    %cst_53 = arith.constant dense<0.000000e+00> : vector<8x96xf32>
    %57 = tpu.matmul %54, %56, %cst_53 {dimension_numbers = #tpu.dot_dimension_numbers<[1], [0], [0], [1], [0, 0, 1, 1], [], []>} : vector<8x120xf32>, vector<120x96xf32>, vector<8x96xf32> -> vector<8x96xf32>
    %58 = arith.addf %53, %57 : vector<8x96xf32>
    %c2_54 = arith.constant 2 : index
    %c0_55 = arith.constant 0 : index
    %59 = vector.load %arg9[%c2_54, %c0_55] : memref<20x120xf32, #tpu.memory_space<vmem>>, vector<8x120xf32>
    %c2_56 = arith.constant 2 : index
    %c0_57 = arith.constant 0 : index
    %c0_58 = arith.constant 0 : index
    %60 = vector.load %arg4[%c2_56, %c0_57, %c0_58] : memref<4x120x96xf32, #tpu.memory_space<vmem>>, vector<1x120x96xf32>
    %61 = vector.shape_cast %60 : vector<1x120x96xf32> to vector<120x96xf32>
    %cst_59 = arith.constant dense<0.000000e+00> : vector<8x96xf32>
    %62 = tpu.matmul %59, %61, %cst_59 {dimension_numbers = #tpu.dot_dimension_numbers<[1], [0], [0], [1], [0, 0, 1, 1], [], []>} : vector<8x120xf32>, vector<120x96xf32>, vector<8x96xf32> -> vector<8x96xf32>
    %63 = arith.addf %58, %62 : vector<8x96xf32>
    %c12_60 = arith.constant 12 : index
    %c0_61 = arith.constant 0 : index
    %64 = vector.load %arg9[%c12_60, %c0_61] : memref<20x120xf32, #tpu.memory_space<vmem>>, vector<8x120xf32>
    %c3_62 = arith.constant 3 : index
    %c0_63 = arith.constant 0 : index
    %c0_64 = arith.constant 0 : index
    %65 = vector.load %arg4[%c3_62, %c0_63, %c0_64] : memref<4x120x96xf32, #tpu.memory_space<vmem>>, vector<1x120x96xf32>
    %66 = vector.shape_cast %65 : vector<1x120x96xf32> to vector<120x96xf32>
    %cst_65 = arith.constant dense<0.000000e+00> : vector<8x96xf32>
    %67 = tpu.matmul %64, %66, %cst_65 {dimension_numbers = #tpu.dot_dimension_numbers<[1], [0], [0], [1], [0, 0, 1, 1], [], []>} : vector<8x120xf32>, vector<120x96xf32>, vector<8x96xf32> -> vector<8x96xf32>
    %68 = arith.addf %63, %67 : vector<8x96xf32>
    %c0_66 = arith.constant 0 : index
    %c0_67 = arith.constant 0 : index
    %69 = vector.load %arg5[%c0_66, %c0_67] : memref<1x96xf32, #tpu.memory_space<vmem>>, vector<1x96xf32>
    %70 = vector.broadcast %69 : vector<1x96xf32> to vector<8x96xf32>
    %71 = arith.addf %68, %70 : vector<8x96xf32>
    %cst_68 = arith.constant 0.000000e+00 : f32
    %72 = vector.broadcast %cst_68 : f32 to vector<8x96xf32>
    %73 = arith.maximumf %71, %72 : vector<8x96xf32>
    %cst_69 = arith.constant 0.000000e+00 : f32
    %74 = vector.broadcast %cst_69 : f32 to vector<12x24xf32>
    %c0_70 = arith.constant 0 : index
    %c0_71 = arith.constant 0 : index
    %75 = vector.load %arg10[%c0_70, %c0_71] : memref<12x144xf32, #tpu.memory_space<vmem>>, vector<12x24xf32>
    tpu.vector_store %arg10[%c0_70, %c0_71], %74 {strides = array<i32>} : memref<12x144xf32, #tpu.memory_space<vmem>>, vector<12x24xf32>,
    %c0_72 = arith.constant 0 : index
    %c120 = arith.constant 120 : index
    %76 = vector.load %arg10[%c0_72, %c120] : memref<12x144xf32, #tpu.memory_space<vmem>>, vector<12x24xf32>
    tpu.vector_store %arg10[%c0_72, %c120], %74 {strides = array<i32>} : memref<12x144xf32, #tpu.memory_space<vmem>>, vector<12x24xf32>,
    %cst_73 = arith.constant 0.000000e+00 : f32
    %77 = vector.broadcast %cst_73 : f32 to vector<2x144xf32>
    %c0_74 = arith.constant 0 : index
    %c0_75 = arith.constant 0 : index
    %78 = vector.load %arg10[%c0_74, %c0_75] : memref<12x144xf32, #tpu.memory_space<vmem>>, vector<2x144xf32>
    tpu.vector_store %arg10[%c0_74, %c0_75], %77 {strides = array<i32>} : memref<12x144xf32, #tpu.memory_space<vmem>>, vector<2x144xf32>,
    %c10_76 = arith.constant 10 : index
    %c0_77 = arith.constant 0 : index
    %79 = vector.load %arg10[%c10_76, %c0_77] : memref<12x144xf32, #tpu.memory_space<vmem>>, vector<2x144xf32>
    tpu.vector_store %arg10[%c10_76, %c0_77], %77 {strides = array<i32>} : memref<12x144xf32, #tpu.memory_space<vmem>>, vector<2x144xf32>,
    %80 = vector.extract_strided_slice %73 {offsets = [0, 0], sizes = [2, 96], strides = [1, 1]} : vector<8x96xf32> to vector<2x96xf32>
    %c6_78 = arith.constant 6 : index
    %c24 = arith.constant 24 : index
    %81 = vector.load %arg10[%c6_78, %c24] : memref<12x144xf32, #tpu.memory_space<vmem>>, vector<2x96xf32>
    tpu.vector_store %arg10[%c6_78, %c24], %80 {strides = array<i32>} : memref<12x144xf32, #tpu.memory_space<vmem>>, vector<2x96xf32>,
    %82 = vector.extract_strided_slice %73 {offsets = [2, 0], sizes = [2, 96], strides = [1, 1]} : vector<8x96xf32> to vector<2x96xf32>
    %c2_79 = arith.constant 2 : index
    %c24_80 = arith.constant 24 : index
    %83 = vector.load %arg10[%c2_79, %c24_80] : memref<12x144xf32, #tpu.memory_space<vmem>>, vector<2x96xf32>
    tpu.vector_store %arg10[%c2_79, %c24_80], %82 {strides = array<i32>} : memref<12x144xf32, #tpu.memory_space<vmem>>, vector<2x96xf32>,
    %84 = vector.extract_strided_slice %73 {offsets = [4, 0], sizes = [2, 96], strides = [1, 1]} : vector<8x96xf32> to vector<2x96xf32>
    %c8_81 = arith.constant 8 : index
    %c24_82 = arith.constant 24 : index
    %85 = vector.load %arg10[%c8_81, %c24_82] : memref<12x144xf32, #tpu.memory_space<vmem>>, vector<2x96xf32>
    tpu.vector_store %arg10[%c8_81, %c24_82], %84 {strides = array<i32>} : memref<12x144xf32, #tpu.memory_space<vmem>>, vector<2x96xf32>,
    %86 = vector.extract_strided_slice %73 {offsets = [6, 0], sizes = [2, 96], strides = [1, 1]} : vector<8x96xf32> to vector<2x96xf32>
    %c4_83 = arith.constant 4 : index
    %c24_84 = arith.constant 24 : index
    %87 = vector.load %arg10[%c4_83, %c24_84] : memref<12x144xf32, #tpu.memory_space<vmem>>, vector<2x96xf32>
    tpu.vector_store %arg10[%c4_83, %c24_84], %86 {strides = array<i32>} : memref<12x144xf32, #tpu.memory_space<vmem>>, vector<2x96xf32>,
    %c0_85 = arith.constant 0 : index
    %c0_86 = arith.constant 0 : index
    %88 = vector.load %arg10[%c0_85, %c0_86] : memref<12x144xf32, #tpu.memory_space<vmem>>, vector<4x144xf32>
    %c0_87 = arith.constant 0 : index
    %c0_88 = arith.constant 0 : index
    %c0_89 = arith.constant 0 : index
    %89 = vector.load %arg6[%c0_87, %c0_88, %c0_89] : memref<4x144x96xf32, #tpu.memory_space<vmem>>, vector<1x144x96xf32>
    %90 = vector.shape_cast %89 : vector<1x144x96xf32> to vector<144x96xf32>
    %cst_90 = arith.constant dense<0.000000e+00> : vector<4x96xf32>
    %91 = tpu.matmul %88, %90, %cst_90 {dimension_numbers = #tpu.dot_dimension_numbers<[1], [0], [0], [1], [0, 0, 1, 1], [], []>} : vector<4x144xf32>, vector<144x96xf32>, vector<4x96xf32> -> vector<4x96xf32>
    %c6_91 = arith.constant 6 : index
    %c0_92 = arith.constant 0 : index
    %92 = vector.load %arg10[%c6_91, %c0_92] : memref<12x144xf32, #tpu.memory_space<vmem>>, vector<4x144xf32>
    %c1_93 = arith.constant 1 : index
    %c0_94 = arith.constant 0 : index
    %c0_95 = arith.constant 0 : index
    %93 = vector.load %arg6[%c1_93, %c0_94, %c0_95] : memref<4x144x96xf32, #tpu.memory_space<vmem>>, vector<1x144x96xf32>
    %94 = vector.shape_cast %93 : vector<1x144x96xf32> to vector<144x96xf32>
    %cst_96 = arith.constant dense<0.000000e+00> : vector<4x96xf32>
    %95 = tpu.matmul %92, %94, %cst_96 {dimension_numbers = #tpu.dot_dimension_numbers<[1], [0], [0], [1], [0, 0, 1, 1], [], []>} : vector<4x144xf32>, vector<144x96xf32>, vector<4x96xf32> -> vector<4x96xf32>
    %96 = arith.addf %91, %95 : vector<4x96xf32>
    %c2_97 = arith.constant 2 : index
    %c0_98 = arith.constant 0 : index
    %97 = vector.load %arg10[%c2_97, %c0_98] : memref<12x144xf32, #tpu.memory_space<vmem>>, vector<4x144xf32>
    %c2_99 = arith.constant 2 : index
    %c0_100 = arith.constant 0 : index
    %c0_101 = arith.constant 0 : index
    %98 = vector.load %arg6[%c2_99, %c0_100, %c0_101] : memref<4x144x96xf32, #tpu.memory_space<vmem>>, vector<1x144x96xf32>
    %99 = vector.shape_cast %98 : vector<1x144x96xf32> to vector<144x96xf32>
    %cst_102 = arith.constant dense<0.000000e+00> : vector<4x96xf32>
    %100 = tpu.matmul %97, %99, %cst_102 {dimension_numbers = #tpu.dot_dimension_numbers<[1], [0], [0], [1], [0, 0, 1, 1], [], []>} : vector<4x144xf32>, vector<144x96xf32>, vector<4x96xf32> -> vector<4x96xf32>
    %101 = arith.addf %96, %100 : vector<4x96xf32>
    %c8_103 = arith.constant 8 : index
    %c0_104 = arith.constant 0 : index
    %102 = vector.load %arg10[%c8_103, %c0_104] : memref<12x144xf32, #tpu.memory_space<vmem>>, vector<4x144xf32>
    %c3_105 = arith.constant 3 : index
    %c0_106 = arith.constant 0 : index
    %c0_107 = arith.constant 0 : index
    %103 = vector.load %arg6[%c3_105, %c0_106, %c0_107] : memref<4x144x96xf32, #tpu.memory_space<vmem>>, vector<1x144x96xf32>
    %104 = vector.shape_cast %103 : vector<1x144x96xf32> to vector<144x96xf32>
    %cst_108 = arith.constant dense<0.000000e+00> : vector<4x96xf32>
    %105 = tpu.matmul %102, %104, %cst_108 {dimension_numbers = #tpu.dot_dimension_numbers<[1], [0], [0], [1], [0, 0, 1, 1], [], []>} : vector<4x144xf32>, vector<144x96xf32>, vector<4x96xf32> -> vector<4x96xf32>
    %106 = arith.addf %101, %105 : vector<4x96xf32>
    %c0_109 = arith.constant 0 : index
    %c0_110 = arith.constant 0 : index
    %107 = vector.load %arg7[%c0_109, %c0_110] : memref<1x96xf32, #tpu.memory_space<vmem>>, vector<1x96xf32>
    %108 = vector.broadcast %107 : vector<1x96xf32> to vector<4x96xf32>
    %109 = arith.addf %106, %108 : vector<4x96xf32>
    %cst_111 = arith.constant 0.000000e+00 : f32
    %110 = vector.broadcast %cst_111 : f32 to vector<4x96xf32>
    %111 = arith.maximumf %109, %110 : vector<4x96xf32>
    %c0_112 = arith.constant 0 : index
    %c0_113 = arith.constant 0 : index
    %c0_114 = arith.constant 0 : index
    %112 = vector.load %arg8[%c0_112, %c0_113, %c0_114] : memref<1x4x96xf32, #tpu.memory_space<vmem>>, vector<1x4x96xf32>
    %113 = vector.shape_cast %112 : vector<1x4x96xf32> to vector<4x96xf32>
    %114 = vector.shape_cast %111 : vector<4x96xf32> to vector<1x4x96xf32>
    tpu.vector_store %arg8[%c0_112, %c0_113, %c0_114], %114 {strides = array<i32>} : memref<1x4x96xf32, #tpu.memory_space<vmem>>, vector<1x4x96xf32>,
    return
  }
  func.func @transform_0(%arg0: i32) -> (i32, i32, i32) {
    %c0_i32 = arith.constant 0 : i32
    %c0_i32_0 = arith.constant 0 : i32
    %c0_i32_1 = arith.constant 0 : i32
    return %arg0, %c0_i32, %c0_i32_0 : i32, i32, i32
  }
  func.func @transform_1(%arg0: i32) -> (i32, i32, i32) {
    %c0_i32 = arith.constant 0 : i32
    %c0_i32_0 = arith.constant 0 : i32
    %c0_i32_1 = arith.constant 0 : i32
    %c0_i32_2 = arith.constant 0 : i32
    return %c0_i32, %c0_i32_0, %c0_i32_1 : i32, i32, i32
  }
  func.func @transform_2(%arg0: i32) -> (i32, i32) {
    %c0_i32 = arith.constant 0 : i32
    %c0_i32_0 = arith.constant 0 : i32
    %c0_i32_1 = arith.constant 0 : i32
    return %c0_i32, %c0_i32_0 : i32, i32
  }
  func.func @transform_3(%arg0: i32) -> (i32, i32, i32) {
    %c0_i32 = arith.constant 0 : i32
    %c0_i32_0 = arith.constant 0 : i32
    %c0_i32_1 = arith.constant 0 : i32
    %c0_i32_2 = arith.constant 0 : i32
    return %c0_i32, %c0_i32_0, %c0_i32_1 : i32, i32, i32
  }
  func.func @transform_4(%arg0: i32) -> (i32, i32) {
    %c0_i32 = arith.constant 0 : i32
    %c0_i32_0 = arith.constant 0 : i32
    %c0_i32_1 = arith.constant 0 : i32
    return %c0_i32, %c0_i32_0 : i32, i32
  }
  func.func @transform_5(%arg0: i32) -> (i32, i32, i32) {
    %c0_i32 = arith.constant 0 : i32
    %c0_i32_0 = arith.constant 0 : i32
    %c0_i32_1 = arith.constant 0 : i32
    %c0_i32_2 = arith.constant 0 : i32
    return %c0_i32, %c0_i32_0, %c0_i32_1 : i32, i32, i32
  }
  func.func @transform_6(%arg0: i32) -> (i32, i32) {
    %c0_i32 = arith.constant 0 : i32
    %c0_i32_0 = arith.constant 0 : i32
    %c0_i32_1 = arith.constant 0 : i32
    return %c0_i32, %c0_i32_0 : i32, i32
  }
  func.func @transform_7(%arg0: i32) -> (i32, i32, i32) {
    %c0_i32 = arith.constant 0 : i32
    %c0_i32_0 = arith.constant 0 : i32
    %c0_i32_1 = arith.constant 0 : i32
    return %arg0, %c0_i32, %c0_i32_0 : i32, i32, i32
  }
}

</mosaic_0001>

<bundles_post_ra>
// kernel: encoder_forward.1
= control target key start
LH: loop header
LB: loop body
LE: loop exit
PB: predicated region body
PF: predicated region fallthrough
CT: control target
= control target key end

     0   :  { %vm52_vm0 = vcmask 1045504   ;;  %vm45_vm1 = vcmask 441344   ;;  %vm207_vm2 = vcmask 97280   ;;  %vm212_vm3 = vcmask 982880   ;;  %s879_s10 = smov 12   ;;  %s880_s24 = smov 24   ;;  %s1474_s1 = inlined_call_operand.vmem [shape: f32[4,54,96], index: 1, kind: input, shape index: {}]   ;;  %s1475_s0 = inlined_call_operand.vmem [shape: f32[1,36,54], index: 0, kind: input, shape index: {}]   ;;  %s1476_s2 = inlined_call_operand.vmem [shape: f32[1,96], index: 2, kind: input, shape index: {}]   ;;  %s1477_s3 = inlined_call_operand.vmem [shape: f32[4,120,96], index: 3, kind: input, shape index: {}]   ;;  %s1478_s4 = inlined_call_operand.vmem [shape: f32[1,96], index: 4, kind: input, shape index: {}]   ;;  %s1479_s5 = inlined_call_operand.vmem [shape: f32[4,144,96], index: 5, kind: input, shape index: {}]   ;;  %s1480_s6 = inlined_call_operand.vmem [shape: f32[1,96], index: 6, kind: input, shape index: {}]   ;;  %s1481_s7 = inlined_call_operand.vmem [shape: f32[1,4,96], index: 7, kind: output, shape index: {}]  }
   0x1   :  { %v751_v0 = vld [vmem:[%s1474_s1 + $0xa0] sm:$0x3f]  ;;  %v750_v1 = vld [vmem:[%s1474_s1 + $0x98] sm:$0xff]  ;;  %v738_v3 = vld [vmem:[%s1474_s1 + $0x68] sm:$0x3f]  ;;  %v878_v42 = vmov 0.0  }
   0x2   :  { %v761_v2 = vld [vmem:[%s1474_s1 + $0xd8] sm:$0x3f]  ;;  %752 = vmatpush.msk.msra.mxu2 %vm52_vm0, %v751_v0  ;;  %v34_v4 = vld [vmem:[%s1474_s1 + $0x30] sm:$0x3f]  ;;  %739 = vmatpush.msk.msra.mxu0 %vm52_vm0, %v738_v3  ;;  %v737_v7 = vld [vmem:[%s1474_s1 + $0x60] sm:$0xff]  ;;  %208 = vst.msk [vmem:[#allocation2] sm:$0xff] %vm207_vm2, %v878_v42 }
   0x3   :  { %762 = vmatpush.msk.msra.mxu3 %vm52_vm0, %v761_v2  ;;  %v749_v5 = vld [vmem:[%s1474_s1 + $0x90] sm:$0xff]  ;;  %742 = vmatpush.msk.msra.mxu1 %vm52_vm0, %v34_v4  ;;  %v33_v8 = vld [vmem:[%s1474_s1 + $0x28] sm:$0xff]  ;;  %v736_v10 = vld [vmem:[%s1474_s1 + $0x58] sm:$0xff]  ;;  %209 = vst.msk [vmem:[#allocation2 + $0x8] sm:$0xff] %vm207_vm2, %v878_v42  ;;  %vm210_vm4 = vcmask 93184   ;;  %vm215_vm5 = vcmask 978784  }
   0x4   :  { %v760_v6 = vld [vmem:[%s1474_s1 + $0xd0] sm:$0xff]  ;;  %140 = vmatpush.msra.mxu2 %v750_v1  ;;  %v759_v9 = vld [vmem:[%s1474_s1 + $0xc8] sm:$0xff]  ;;  %66 = vmatpush.msra.mxu0 %v737_v7  ;;  %v32_v12 = vld [vmem:[%s1474_s1 + $0x20] sm:$0xff]  ;;  %213 = vst.msk [vmem:[#allocation2] sm:$0xff] %vm212_vm3, %v878_v42  ;;  %vm217_vm6 = vcmask 975872   ;;  %vm224_vm7 = vcmask 877664  }
   0x5   :  { %184 = vmatpush.msra.mxu3 %v760_v6  ;;  %98 = vmatpush.msra.mxu1 %v33_v8  ;;  %v748_v11 = vld [vmem:[%s1474_s1 + $0x88] sm:$0xff]  ;;  %v758_v13 = vld [vmem:[%s1474_s1 + $0xc0] sm:$0xff]  ;;  %v735_v14 = vld [vmem:[%s1474_s1 + $0x50] sm:$0xff]  ;;  %214 = vst.msk [vmem:[#allocation2 + $0x8] sm:$0xff] %vm212_vm3, %v878_v42  ;;  %vm226_vm8 = vcmask 879714   ;;  %vm228_vm9 = vcmask 881764  }
   0x6   :  { %141 = vmatpush.msra.mxu2 %v749_v5  ;;  %v31_v15 = vld [vmem:[%s1474_s1 + $0x18] sm:$0xff]  ;;  %67 = vmatpush.msra.mxu0 %v736_v10  ;;  %v747_v16 = vld [vmem:[%s1474_s1 + $0x80] sm:$0xff]  ;;  %v734_v18 = vld [vmem:[%s1474_s1 + $0x48] sm:$0xff]  ;;  %211 = vst.msk [vmem:[#allocation2 + $0x10] sm:$0xf] %vm210_vm4, %v878_v42  ;;  %vm230_vm10 = vcmask 883814  }
   0x7   :  { %185 = vmatpush.msra.mxu3 %v759_v9  ;;  %99 = vmatpush.msra.mxu1 %v32_v12  ;;  %v757_v17 = vld [vmem:[%s1474_s1 + $0xb8] sm:$0xff]  ;;  %v30_v19 = vld [vmem:[%s1474_s1 + $0x10] sm:$0xff]  ;;  %v733_v22 = vld [vmem:[%s1474_s1 + $0x40] sm:$0xff]  ;;  %216 = vst.msk [vmem:[#allocation2 + $0x10] sm:$0xf] %vm215_vm5, %v878_v42  ;;  %vm273_vm11 = vcmask 982016  }
   0x8   :  { %142 = vmatpush.msra.mxu2 %v748_v11  ;;  %68 = vmatpush.msra.mxu0 %v735_v14  ;;  %v746_v20 = vld [vmem:[%s1474_s1 + $0x78] sm:$0xff]  ;;  %v756_v21 = vld [vmem:[%s1474_s1 + $0xb0] sm:$0xff]  ;;  %v29_v23 = vld [vmem:[%s1474_s1 + $0x8] sm:$0xff]  ;;  %218 = vst.msk [vmem:[#allocation2] sm:$0x3] %vm217_vm6, %v878_v42  ;;  %vm410_vm12 = vcmask 191488  }
   0x9   :  { %186 = vmatpush.msra.mxu3 %v758_v13  ;;  %100 = vmatpush.msra.mxu1 %v31_v15  ;;  %v745_v24 = vld [vmem:[%s1474_s1 + $0x70] sm:$0xff]  ;;  %v755_v25 = vld [vmem:[%s1474_s1 + $0xa8] sm:$0xff]  ;;  %v732_v28 = vld [vmem:[%s1474_s1 + $0x38] sm:$0xff]  ;;  %219 = vst.msk [vmem:[#allocation2 + $0x12] sm:$0x3] %vm217_vm6, %v878_v42  ;;  %vm416_vm13 = vcmask 1044416  }
   0xa   :  { %143 = vmatpush.msra.mxu2 %v747_v16  ;;  %69 = vmatpush.msra.mxu0 %v734_v18  ;;  %v111_v26 = vld [vmem:[%s1475_s0 + $0x2] sm:$0xff]  ;;  %v155_v27 = vld [vmem:[%s1475_s0 + $0x14] sm:$0xff]  ;;  %v112_v32 = vld [vmem:[%s1475_s0 + $0xa] sm:$0xff]  ;;  %411 = vst.msk [vmem:[#allocation3 + $0x10] sm:$0xf] %vm410_vm12, %v878_v42  ;;  %vm414_vm14 = vcmask 130048  }
   0xb   :  { %187 = vmatpush.msra.mxu3 %v757_v17  ;;  %101 = vmatpush.msra.mxu1 %v30_v19  ;;  %v28_v29 = vld [vmem:[%s1474_s1] sm:$0xff]  ;;  %v35_v30 = vld [vmem:[%s1475_s0 + $0x12] sm:$0xff]  ;;  %v27_v35 = vld [vmem:[%s1475_s0 + $0x8] sm:$0xff]  ;;  %417 = vst.msk [vmem:[#allocation3 + $0x10] sm:$0xf] %vm416_vm13, %v878_v42  ;;  %vm421_vm15 = vcmask 123904  }
   0xc   :  { %144 = vmatpush.msra.mxu2 %v746_v20  ;;  %70 = vmatpush.msra.mxu0 %v733_v22  ;;  %v26_v31 = vld [vmem:[%s1475_s0] sm:$0xff]  ;;  %v779_v36 = vld [vmem:[%s1477_s3 + $0xe8] sm:$0xff]  ;;  %v255_v37 = vld [vmem:[%s1477_s3 + $0x70] sm:$0xff]  ;;  %423 = vst [vmem:[#allocation3 + $0x10] sm:$0xc] %v878_v42  ;;  %vm408_vm0 = vcmask 195584  }
   0xd   :  { %188 = vmatpush.msra.mxu3 %v756_v21  ;;  %102 = vmatpush.msra.mxu1 %v29_v23  ;;  %v156_v33 = vld [vmem:[%s1475_s0 + $0x1c] sm:$0xff]  ;;  %v254_v41 = vld [vmem:[%s1477_s3 + $0x68] sm:$0xff]  ;;  %v811_v44 = vld [vmem:[%s1477_s3 + $0x1d0] sm:$0xff]  ;;  %415 = vst.msk [vmem:[#allocation3 + $0x8] sm:$0xff] %vm414_vm14, %v878_v42  ;;  %vm418_vm2 = vcmask 125952   ;;  %vm442_vm3 = vcmask 976064  }
   0xe   :  { %145 = vmatpush.msra.mxu2 %v745_v24  ;;  %71 = vmatpush.msra.mxu0 %v732_v28  ;;  %v36_v34 = vld [vmem:[%s1475_s0 + $0x1a] sm:$0xff]  ;;  %v794_v47 = vld [vmem:[%s1477_s3 + $0x150] sm:$0xff]  ;;  %v810_v48 = vld [vmem:[%s1477_s3 + $0x1c8] sm:$0xff]  ;;  %422 = vst.msk [vmem:[#allocation3 + $0x8] sm:$0x3] %vm421_vm15, %v878_v42  ;;  %vm493_vm4 = vcmask 1041408  }
   0xf   :  { %189 = vmatpush.msra.mxu3 %v755_v25  ;;  %753 = vmatmul.msk.f32.vlgmr.msra.gmra.mxu2 %vm45_vm1, %v111_v26  ;;  %v796_v38 = vld [vmem:[%s1477_s3 + $0x160] sm:$0xff]  ;;  %v812_v39 = vld [vmem:[%s1477_s3 + $0x1d8] sm:$0xff]  ;;  %v776_v49 = vld [vmem:[%s1477_s3 + $0xd0] sm:$0xff]  ;;  %409 = vst.msk [vmem:[#allocation3] sm:$0xff] %vm408_vm0, %v878_v42  ;;  %vm424_vm5 = vcmask 125954   ;;  %vm436_vm6 = vcmask 978114  }
  0x10   :  { %763 = vmatmul.msk.f32.vlgmr.msra.gmra.mxu3 %vm45_vm1, %v155_v27  ;;  %103 = vmatpush.msra.mxu1 %v28_v29  ;;  %v778_v40 = vld [vmem:[%s1477_s3 + $0xe0] sm:$0xff]  ;;  %v795_v43 = vld [vmem:[%s1477_s3 + $0x158] sm:$0xff]  ;;  %v793_v51 = vld [vmem:[%s1477_s3 + $0x148] sm:$0xff]  ;;  %419 = vst.msk [vmem:[#allocation3 + $0x18] sm:$0xf] %vm418_vm2, %v878_v42 }
  0x11   :  { %740 = vmatmul.msk.f32.vlgmr.msra.gmra.mxu0 %vm45_vm1, %v35_v30  ;;  %743 = vmatmul.msk.f32.vlgmr.msra.gmra.mxu1 %vm45_vm1, %v26_v31  ;;  %v777_v45 = vld [vmem:[%s1477_s3 + $0xd8] sm:$0xff]  ;;  %v253_v46 = vld [vmem:[%s1477_s3 + $0x60] sm:$0xff]  ;;  %v775_v53 = vld [vmem:[%s1477_s3 + $0xc8] sm:$0xff]  ;;  %425 = vst.msk [vmem:[#allocation3 + $0x18] sm:$0xc] %vm424_vm5, %v878_v42 }
  0x12   :  { %278 = vmatpush.msrb.mxu0 %v779_v36  ;;  %301 = vmatpush.msrb.mxu1 %v255_v37  ;;  %v252_v50 = vld [vmem:[%s1477_s3 + $0x58] sm:$0xff]  ;;  %v809_v52 = vld [vmem:[%s1477_s3 + $0x1c0] sm:$0xff]  ;;  %v251_v54 = vld [vmem:[%s1477_s3 + $0x50] sm:$0xff] }
  0x13   :  { %341 = vmatpush.msrb.mxu2 %v796_v38  ;;  %382 = vmatpush.msrb.mxu3 %v812_v39  ;;  %v792_v55 = vld [vmem:[%s1477_s3 + $0x140] sm:$0xff]  ;;  %v808_v56 = vld [vmem:[%s1477_s3 + $0x1b8] sm:$0xff]  ;;  %v250_v58 = vld [vmem:[%s1477_s3 + $0x48] sm:$0xff] }
  0x14   :  { %279 = vmatpush.msrb.mxu0 %v778_v40  ;;  %302 = vmatpush.msrb.mxu1 %v254_v41  ;;  %v774_v57 = vld [vmem:[%s1477_s3 + $0xc0] sm:$0xff]  ;;  %v791_v59 = vld [vmem:[%s1477_s3 + $0x138] sm:$0xff]  ;;  %v807_v60 = vld [vmem:[%s1477_s3 + $0x1b0] sm:$0xff] }
  0x15   :  { %342 = vmatpush.msrb.mxu2 %v795_v43  ;;  %383 = vmatpush.msrb.mxu3 %v811_v44  ;;  %v773_v61 = vld [vmem:[%s1477_s3 + $0xb8] sm:$0xff]  ;;  %v249_v62 = vld [vmem:[%s1477_s3 + $0x40] sm:$0xff]  ;;  %v790_v1 = vld [vmem:[%s1477_s3 + $0x130] sm:$0xff] }
  0x16   :  { %280 = vmatpush.msrb.mxu0 %v777_v45  ;;  %303 = vmatpush.msrb.mxu1 %v253_v46  ;;  %v806_v2 = vld [vmem:[%s1477_s3 + $0x1a8] sm:$0xff]  ;;  %v875_v7 = vld [vmem:[%s1476_s2] ss:$0 sm:$0xff]  ;;  %v772_v20 = vld [vmem:[%s1477_s3 + $0xb0] sm:$0xff] }
  0x17   :  { %754 = vmatmul.msk.f32.gmra.mxu2 %vm45_vm1, %v112_v32  ;;  %384 = vmatpush.msrb.mxu3 %v810_v48  ;;  %v248_v21 = vld [vmem:[%s1477_s3 + $0x38] sm:$0xff]  ;;  %v789_v22 = vld [vmem:[%s1477_s3 + $0x128] sm:$0xff]  ;;  %v805_v23 = vld [vmem:[%s1477_s3 + $0x1a0] sm:$0xff] }
  0x18   :  { %764 = vmatmul.msk.f32.gmra.mxu3 %vm45_vm1, %v156_v33  ;;  %343 = vmatpush.msrb.mxu2 %v794_v47  ;;  %v771_v24 = vld [vmem:[%s1477_s3 + $0xa8] sm:$0xff]  ;;  %v247_v25 = vld [vmem:[%s1477_s3 + $0x30] sm:$0xff]  ;;  %v788_v26 = vld [vmem:[%s1477_s3 + $0x120] sm:$0xff] }
  0x19   :  { %741 = vmatmul.msk.f32.gmra.mxu0 %vm45_vm1, %v36_v34  ;;  %744 = vmatmul.msk.f32.gmra.mxu1 %vm45_vm1, %v27_v35  ;;  %v804_v27 = vld [vmem:[%s1477_s3 + $0x198] sm:$0xff]  ;;  %v770_v28 = vld [vmem:[%s1477_s3 + $0xa0] sm:$0xff]  ;;  %v246_v29 = vld [vmem:[%s1477_s3 + $0x28] sm:$0xff]  ;;  %vm412_vm1 = vcmask 1048512  }
  0x1a   :  { %281 = vmatpush.msrb.mxu0 %v776_v49  ;;  %304 = vmatpush.msrb.mxu1 %v252_v50  ;;  %v787_v30 = vld [vmem:[%s1477_s3 + $0x118] sm:$0xff]  ;;  %v803_v31 = vld [vmem:[%s1477_s3 + $0x190] sm:$0xff]  ;;  %v245_v33 = vld [vmem:[%s1477_s3 + $0x20] sm:$0xff]  ;;  %413 = vst.msk [vmem:[#allocation3] sm:$0xff] %vm412_vm1, %v878_v42 }
  0x1b   :  { %344 = vmatpush.msrb.mxu2 %v793_v51  ;;  %385 = vmatpush.msrb.mxu3 %v809_v52  ;;  %v769_v32 = vld [vmem:[%s1477_s3 + $0x98] sm:$0xff]  ;;  %v786_v34 = vld [vmem:[%s1477_s3 + $0x110] sm:$0xff]  ;;  %v802_v35 = vld [vmem:[%s1477_s3 + $0x188] sm:$0xff]  ;;  %420 = vst [vmem:[#allocation3] sm:$0x3] %v878_v42 }
  0x1c   :  { %282 = vmatpush.msrb.mxu0 %v775_v53  ;;  %305 = vmatpush.msrb.mxu1 %v251_v54  ;;  %v768_v36 = vld [vmem:[%s1477_s3 + $0x90] sm:$0xff]  ;;  %v244_v37 = vld [vmem:[%s1477_s3 + $0x18] sm:$0xff]  ;;  %v785_v38 = vld [vmem:[%s1477_s3 + $0x108] sm:$0xff] }
  0x1d   :  { %345 = vmatpush.msrb.mxu2 %v792_v55  ;;  %386 = vmatpush.msrb.mxu3 %v808_v56  ;;  %v801_v39 = vld [vmem:[%s1477_s3 + $0x180] sm:$0xff]  ;;  %v767_v40 = vld [vmem:[%s1477_s3 + $0x88] sm:$0xff]  ;;  %v243_v41 = vld [vmem:[%s1477_s3 + $0x10] sm:$0xff] }
  0x1e   :  { %283 = vmatpush.msrb.mxu0 %v774_v57  ;;  %306 = vmatpush.msrb.mxu1 %v250_v58  ;;  %v784_v43 = vld [vmem:[%s1477_s3 + $0x100] sm:$0xff]  ;;  %v800_v44 = vld [vmem:[%s1477_s3 + $0x178] sm:$0xff]  ;;  %v242_v46 = vld [vmem:[%s1477_s3 + $0x8] sm:$0xff] }
  0x1f   :  { %346 = vmatpush.msrb.mxu2 %v791_v59  ;;  %387 = vmatpush.msrb.mxu3 %v807_v60  ;;  %v766_v45 = vld [vmem:[%s1477_s3 + $0x80] sm:$0xff]  ;;  %v783_v47 = vld [vmem:[%s1477_s3 + $0xf8] sm:$0xff]  ;;  %v799_v48 = vld [vmem:[%s1477_s3 + $0x170] sm:$0xff] }
  0x20   :  { %284 = vmatpush.msrb.mxu0 %v773_v61  ;;  %307 = vmatpush.msrb.mxu1 %v249_v62  ;;  %v765_v49 = vld [vmem:[%s1477_s3 + $0x78] sm:$0xff]  ;;  %v241_v50 = vld [vmem:[%s1477_s3] sm:$0xff]  ;;  %v782_v51 = vld [vmem:[%s1477_s3 + $0xf0] sm:$0xff] }
  0x21   :  { %347 = vmatpush.msrb.mxu2 %v790_v1  ;;  %388 = vmatpush.msrb.mxu3 %v806_v2  ;;  %v798_v52 = vld [vmem:[%s1477_s3 + $0x168] sm:$0xff]  ;;  %v850_v60 = vld [vmem:[%s1479_s5 + $0x1a0] sm:$0xff]  ;;  %v865_v1 = vld [vmem:[%s1479_s5 + $0x210] sm:$0xff] }
  0x22   :  { %285 = vmatpush.msrb.mxu0 %v772_v20  ;;  %308 = vmatpush.msrb.mxu1 %v248_v21  ;;  %v851_v59 = vld [vmem:[%s1479_s5 + $0x1a8] sm:$0xff]  ;;  %v867_v62 = vld [vmem:[%s1479_s5 + $0x220] sm:$0xff] }
  0x23   :  { %348 = vmatpush.msrb.mxu2 %v789_v22  ;;  %389 = vmatpush.msrb.mxu3 %v805_v23  ;;  %v868_v61 = vld [vmem:[%s1479_s5 + $0x228] sm:$0xff]  ;;  %v587_v22 = vld [vmem:[#allocation3 + $0x8] sm:$0x3c] }
  0x24   :  { %286 = vmatpush.msrb.mxu0 %v771_v24  ;;  %309 = vmatpush.msrb.mxu1 %v247_v25  ;;  %v864_v2 = vld [vmem:[%s1479_s5 + $0x208] sm:$0xff]  ;;  %v610_v23 = vrot.slane %v587_v22, 2  ;;  %v462_v24 = vld [vmem:[%s1479_s5 + $0x70] sm:$0xff] }
  0x25   :  { %349 = vmatpush.msrb.mxu2 %v788_v26  ;;  %390 = vmatpush.msrb.mxu3 %v804_v27  ;;  %v856_v25 = vld [vmem:[%s1479_s5 + $0x1c8] sm:$0xff]  ;;  %v855_v27 = vld [vmem:[%s1479_s5 + $0x1c0] sm:$0xff] }
  0x26   :  { %287 = vmatpush.msrb.mxu0 %v770_v28  ;;  %310 = vmatpush.msrb.mxu1 %v246_v29  ;;  %v461_v26 = vld [vmem:[%s1479_s5 + $0x68] sm:$0xff]  ;;  %v460_v28 = vld [vmem:[%s1479_s5 + $0x60] sm:$0xff]  ;;  %v854_v29 = vld [vmem:[%s1479_s5 + $0x1b8] sm:$0xff] }
  0x27   :  { %350 = vmatpush.msrb.mxu2 %v787_v30  ;;  %391 = vmatpush.msrb.mxu3 %v803_v31  ;;  %v831_v30 = vld [vmem:[%s1479_s5 + $0x118] sm:$0xff]  ;;  %v830_v31 = vld [vmem:[%s1479_s5 + $0x110] sm:$0xff] }
  0x28   :  { %288 = vmatpush.msrb.mxu0 %v769_v32  ;;  %311 = vmatpush.msrb.mxu1 %v245_v33  ;;  %v459_v32 = vld [vmem:[%s1479_s5 + $0x58] sm:$0xff]  ;;  %v853_v33 = vld [vmem:[%s1479_s5 + $0x1b0] sm:$0xff] }
  0x29   :  { %351 = vmatpush.msrb.mxu2 %v786_v34  ;;  %392 = vmatpush.msrb.mxu3 %v802_v35  ;;  %v458_v34 = vld [vmem:[%s1479_s5 + $0x50] sm:$0xff]  ;;  %v849_v35 = vld [vmem:[%s1479_s5 + $0x198] sm:$0xff] }
  0x2a   :  { %289 = vmatpush.msrb.mxu0 %v768_v36  ;;  %312 = vmatpush.msrb.mxu1 %v244_v37  ;;  %v829_v36 = vld [vmem:[%s1479_s5 + $0x108] sm:$0xff] }
  0x2b   :  { %352 = vmatpush.msrb.mxu2 %v785_v38  ;;  %393 = vmatpush.msrb.mxu3 %v801_v39  ;;  %v457_v37 = vld [vmem:[%s1479_s5 + $0x48] sm:$0xff]  ;;  %v848_v38 = vld [vmem:[%s1479_s5 + $0x190] sm:$0xff]  ;;  %v828_v39 = vld [vmem:[%s1479_s5 + $0x100] sm:$0xff] }
  0x2c   :  { %290 = vmatpush.msrb.mxu0 %v767_v40  ;;  %313 = vmatpush.msrb.mxu1 %v243_v41  ;;  %v456_v40 = vld [vmem:[%s1479_s5 + $0x40] sm:$0xff]  ;;  %v847_v41 = vld [vmem:[%s1479_s5 + $0x188] sm:$0xff] }
  0x2d   :  { %353 = vmatpush.msrb.mxu2 %v784_v43  ;;  %394 = vmatpush.msrb.mxu3 %v800_v44  ;;  %v827_v43 = vld [vmem:[%s1479_s5 + $0xf8] sm:$0xff] }
  0x2e   :  { %291 = vmatpush.msrb.mxu0 %v766_v45  ;;  %314 = vmatpush.msrb.mxu1 %v242_v46  ;;  %v455_v44 = vld [vmem:[%s1479_s5 + $0x38] sm:$0xff]  ;;  %v846_v45 = vld [vmem:[%s1479_s5 + $0x180] sm:$0xff]  ;;  %v826_v46 = vld [vmem:[%s1479_s5 + $0xf0] sm:$0xff] }
  0x2f   :  { %354 = vmatpush.msrb.mxu2 %v783_v47  ;;  %395 = vmatpush.msrb.mxu3 %v799_v48  ;;  %v454_v47 = vld [vmem:[%s1479_s5 + $0x30] sm:$0xff]  ;;  %v845_v48 = vld [vmem:[%s1479_s5 + $0x178] sm:$0xff] }
  0x30   :  { %292 = vmatpush.msrb.mxu0 %v765_v49  ;;  %315 = vmatpush.msrb.mxu1 %v241_v50  ;;  %v825_v49 = vld [vmem:[%s1479_s5 + $0xe8] sm:$0xff] }
  0x31   :  { %355 = vmatpush.msrb.mxu2 %v782_v51  ;;  %396 = vmatpush.msrb.mxu3 %v798_v52  ;;  %v453_v50 = vld [vmem:[%s1479_s5 + $0x28] sm:$0xff]  ;;  %v844_v51 = vld [vmem:[%s1479_s5 + $0x170] sm:$0xff]  ;;  %v824_v52 = vld [vmem:[%s1479_s5 + $0xe0] sm:$0xff] }
  0x32   :  { %537 = vmatpush.msra.mxu1 %v831_v30  ;;  %503 = vmatpush.msra.mxu0 %v829_v36 }
  0x33   :  { %648 = vmatpush.msra.mxu3 %v851_v59  ;;  %v450_v59 = vld [vmem:[%s1479_s5 + $0x10] sm:$0xff] }
  0x34   :  { %538 = vmatpush.msra.mxu1 %v830_v31  ;;  %504 = vmatpush.msra.mxu0 %v828_v39 }
  0x35   :  { %649 = vmatpush.msra.mxu3 %v850_v60  ;;  %v841_v60 = vld [vmem:[%s1479_s5 + $0x158] sm:$0xff] }
  0x36   :  { %505 = vmatpush.msra.mxu0 %v827_v43 }
  0x38   :  { %506 = vmatpush.msra.mxu0 %v826_v46 }
  0x3a   :  { %507 = vmatpush.msra.mxu0 %v825_v49 }
  0x3c   :  { %508 = vmatpush.msra.mxu0 %v824_v52 }
  0x8e   :  { %v73_v63 = vpop.f32.mrf.mxu0  ;;  %v105_v0 = vpop.f32.mrf.mxu1 }
  0x8f   :  { %v106_v3 = vadd.f32 %v105_v0, %v73_v63  ;;  %v463_v63 = vld [vmem:[%s1479_s5 + $0x78] sm:$0xff] }
  0x90   :  { %v866_v0 = vld [vmem:[%s1479_s5 + $0x218] sm:$0xff]  ;;  %546 = vmatpush.msra.mxu2 %v463_v63  ;;  %v840_v63 = vld [vmem:[%s1479_s5 + $0x150] sm:$0xff] }
  0x92   :  { %v147_v4 = vpop.f32.mrf.mxu2  ;;  %547 = vmatpush.msra.mxu2 %v462_v24  ;;  %v869_v24 = vld [vmem:[%s1479_s5 + $0x230] sm:$0xff] }
  0x93   :  { %v191_v5 = vpop.f32.mrf.mxu3  ;;  %v153_v6 = vadd.f32 %v147_v4, %v106_v3 }
  0x94   :  { %548 = vmatpush.msra.mxu2 %v461_v26 }
  0x95   :  { %v197_v8 = vadd.f32 %v191_v5, %v153_v6  ;;  %v863_v5 = vld [vmem:[%s1479_s5 + $0x200] sm:$0xff]  ;;  %v862_v6 = vld [vmem:[%s1479_s5 + $0x1f8] sm:$0xff] }
  0x96   :  { %v76_v9 = vpop.f32.mrf.mxu0  ;;  %v108_v10 = vpop.f32.mrf.mxu1  ;;  %549 = vmatpush.msra.mxu2 %v460_v28  ;;  %v447_v28 = vld [vmem:[#allocation3 + $0x8] sm:$0xf] }
  0x97   :  { %v109_v11 = vadd.f32 %v108_v10, %v76_v9  ;;  %v203_v12 = vadd.f32 %v875_v7, %v197_v8  ;;  %v861_v9 = vld [vmem:[%s1479_s5 + $0x1f0] sm:$0xff] }
  0x98   :  { %550 = vmatpush.msra.mxu2 %v459_v32 }
  0x99   :  { %v205_v13 = vmax.f32 %v203_v12, 0.0 }
  0x9a   :  { %v150_v14 = vpop.f32.mrf.mxu2  ;;  %551 = vmatpush.msra.mxu2 %v458_v34 }
  0x9b   :  { %v194_v15 = vpop.f32.mrf.mxu3  ;;  %v154_v16 = vadd.f32 %v150_v14, %v109_v11  ;;  %221 = vrot.lane.b32.xlu0 %v205_v13, %s879_s10  ;;  %v876_v11 = vld [vmem:[%s1478_s4] ss:$0 sm:$0xff]  ;;  %v860_v13 = vld [vmem:[%s1479_s5 + $0x1e8] sm:$0xff] }
  0x9c   :  { %552 = vmatpush.msra.mxu2 %v457_v37 }
  0x9d   :  { %v198_v17 = vadd.f32 %v194_v15, %v154_v16  ;;  %v859_v15 = vld [vmem:[%s1479_s5 + $0x1e0] sm:$0xff] }
  0x9e   :  { %553 = vmatpush.msra.mxu2 %v456_v40 }
  0x9f   :  { %v204_v18 = vadd.f32 %v875_v7, %v198_v17  ;;  %v858_v17 = vld [vmem:[%s1479_s5 + $0x1d8] sm:$0xff] }
  0xa0   :  { %554 = vmatpush.msra.mxu2 %v455_v44 }
  0xa1   :  { %v206_v19 = vmax.f32 %v204_v18, 0.0 }
  0xa2   :  { %555 = vmatpush.msra.mxu2 %v454_v47 }
  0xa3   :  { %233 = vrot.lane.b32.xlu0 %v206_v19, %s879_s10  ;;  %v857_v19 = vld [vmem:[%s1479_s5 + $0x1d0] sm:$0xff] }
  0xa4   :  { %556 = vmatpush.msra.mxu2 %v453_v50 }
 0x10d   :  { %v222_v53 = vpop.permute.xlu0 %221 }
 0x10e   :  { %225 = vst.msk [vmem:[#allocation2 + $0xa] sm:$0x3] %vm224_vm7, %v222_v53 }
 0x10f   :  { %227 = vst.msk [vmem:[#allocation2] sm:$0xc] %vm226_vm8, %v222_v53 }
 0x110   :  { %229 = vst.msk [vmem:[#allocation2 + $0x8] sm:$0x30] %vm228_vm9, %v222_v53 }
 0x111   :  { %231 = vst.msk [vmem:[#allocation2 - $0x2] sm:$0xc0] %vm230_vm10, %v222_v53  ;;  %v452_v53 = vld [vmem:[%s1479_s5 + $0x20] sm:$0xff] }
 0x112   :  { %557 = vmatpush.msra.mxu2 %v452_v53 }
 0x115   :  { %v234_v54 = vpop.permute.xlu0 %233 }
 0x116   :  { %236 = vst.msk [vmem:[#allocation2 + $0xe] sm:$0x3] %vm224_vm7, %v234_v54  ;;  %vm431_vm7 = vcmask 982214  }
 0x117   :  { %237 = vst.msk [vmem:[#allocation2 + $0x4] sm:$0xc] %vm226_vm8, %v234_v54  ;;  %vm444_vm8 = vcmask 980164  }
 0x118   :  { %238 = vst.msk [vmem:[#allocation2 + $0xc] sm:$0x30] %vm228_vm9, %v234_v54  ;;  %vm726_vm9 = vcmask 781312  }
 0x119   :  { %239 = vst.msk [vmem:[#allocation2 + $0x2] sm:$0xc0] %vm230_vm10, %v234_v54  ;;  %v843_v54 = vld [vmem:[%s1479_s5 + $0x168] sm:$0xff] }
 0x11e   :  { %v240_v55 = vld [vmem:[#allocation2] sm:$0xff] }
 0x11f   :  { %v256_v56 = vld [vmem:[#allocation2 + $0xa] sm:$0xff]  ;;  %781 = vmatmul.msk.f32.vlgmr.msrb.gmra.mxu1 %vm273_vm11, %v240_v55  ;;  %v823_v55 = vld [vmem:[%s1479_s5 + $0xd8] sm:$0xff] }
 0x120   :  { %v361_v57 = vld [vmem:[#allocation2 + $0xc] sm:$0xff]  ;;  %780 = vmatmul.msk.f32.vlgmr.msrb.gmra.mxu0 %vm273_vm11, %v256_v56  ;;  %v320_v58 = vld [vmem:[#allocation2 + $0x2] sm:$0xff]  ;;  %614 = vmatpush.msrb.mxu1 %v849_v35  ;;  %v451_v56 = vld [vmem:[%s1479_s5 + $0x18] sm:$0xff] }
 0x121   :  { %813 = vmatmul.msk.f32.vlgmr.msrb.gmra.mxu3 %vm273_vm11, %v361_v57  ;;  %797 = vmatmul.msk.f32.vlgmr.msrb.gmra.mxu2 %vm273_vm11, %v320_v58  ;;  %v842_v57 = vld [vmem:[%s1479_s5 + $0x160] sm:$0xff]  ;;  %v822_v58 = vld [vmem:[%s1479_s5 + $0xd0] sm:$0xff] }
 0x122   :  { %679 = vmatpush.msrb.mxu3 %v868_v61  ;;  %615 = vmatpush.msrb.mxu1 %v848_v38  ;;  %v821_v61 = vld [vmem:[%s1479_s5 + $0xc8] sm:$0xff]  ;;  %v656_v35 = vld [vmem:[#allocation3 + $0x18] sm:$0xf] }
 0x123   :  { %509 = vmatpush.msra.mxu0 %v823_v55  ;;  %558 = vmatpush.msra.mxu2 %v451_v56 }
 0x124   :  { %680 = vmatpush.msrb.mxu3 %v867_v62  ;;  %616 = vmatpush.msrb.mxu1 %v847_v41  ;;  %v449_v62 = vld [vmem:[%s1479_s5 + $0x8] sm:$0xff] }
 0x125   :  { %510 = vmatpush.msra.mxu0 %v822_v58  ;;  %559 = vmatpush.msra.mxu2 %v450_v59 }
 0x126   :  { %681 = vmatpush.msrb.mxu3 %v866_v0  ;;  %617 = vmatpush.msrb.mxu1 %v846_v45  ;;  %v820_v0 = vld [vmem:[%s1479_s5 + $0xc0] sm:$0xff] }
 0x127   :  { %511 = vmatpush.msra.mxu0 %v821_v61  ;;  %560 = vmatpush.msra.mxu2 %v449_v62 }
 0x128   :  { %682 = vmatpush.msrb.mxu3 %v865_v1  ;;  %618 = vmatpush.msrb.mxu1 %v845_v48  ;;  %v448_v1 = vld [vmem:[%s1479_s5] sm:$0xff] }
 0x129   :  { %852 = vmatmul.msk.f32.vlgmr.msra.gmra.mxu3 %vm414_vm14, %v610_v23  ;;  %512 = vmatpush.msra.mxu0 %v820_v0  ;;  %v870_v23 = vld [vmem:[%s1479_s5 + $0x238] sm:$0xff] }
 0x12a   :  { %683 = vmatpush.msrb.mxu3 %v864_v2  ;;  %619 = vmatpush.msrb.mxu1 %v844_v51  ;;  %v839_v2 = vld [vmem:[%s1479_s5 + $0x148] sm:$0xff]  ;;  %v877_v51 = vld [vmem:[%s1480_s6] ss:$0 sm:$0xff] }
 0x12b   :  { %561 = vmatpush.msra.mxu2 %v448_v1 }
 0x12c   :  { %684 = vmatpush.msrb.mxu3 %v863_v5  ;;  %620 = vmatpush.msrb.mxu1 %v843_v54  ;;  %v469_v5 = vld [vmem:[#allocation3 + $0x18] sm:$0x3] }
 0x12e   :  { %685 = vmatpush.msrb.mxu3 %v862_v6  ;;  %621 = vmatpush.msrb.mxu1 %v842_v57 }
 0x130   :  { %686 = vmatpush.msrb.mxu3 %v861_v9  ;;  %622 = vmatpush.msrb.mxu1 %v841_v60  ;;  %v818_v9 = vld [vmem:[%s1479_s5 + $0xb0] sm:$0xff] }
 0x132   :  { %687 = vmatpush.msrb.mxu3 %v860_v13  ;;  %623 = vmatpush.msrb.mxu1 %v840_v63  ;;  %v817_v13 = vld [vmem:[%s1479_s5 + $0xa8] sm:$0xff] }
 0x134   :  { %688 = vmatpush.msrb.mxu3 %v859_v15  ;;  %624 = vmatpush.msrb.mxu1 %v839_v2  ;;  %v464_v15 = vld [vmem:[%s1479_s5 + $0x80] sm:$0xff] }
 0x136   :  { %689 = vmatpush.msrb.mxu3 %v858_v17  ;;  %v816_v17 = vld [vmem:[%s1479_s5 + $0xa0] sm:$0xff] }
 0x138   :  { %690 = vmatpush.msrb.mxu3 %v857_v19  ;;  %v815_v19 = vld [vmem:[%s1479_s5 + $0x98] sm:$0xff] }
 0x13a   :  { %691 = vmatpush.msrb.mxu3 %v856_v25 }
 0x13c   :  { %692 = vmatpush.msrb.mxu3 %v855_v27 }
 0x13e   :  { %693 = vmatpush.msrb.mxu3 %v854_v29 }
 0x140   :  { %694 = vmatpush.msrb.mxu3 %v853_v33 }
 0x19c   :  { %v317_v4 = vpop.f32.mrf.mxu1 }
 0x19d   :  { %v294_v3 = vpop.f32.mrf.mxu0 }
 0x19e   :  { %v318_v7 = vadd.f32 %v317_v4, %v294_v3  ;;  %v467_v3 = vld [vmem:[#allocation3 + $0x8] sm:$0xc0]  ;;  %v819_v4 = vld [vmem:[%s1479_s5 + $0xb8] sm:$0xff] }
 0x19f   :  { %v497_v6 = vrot.slane %v467_v3, 6  ;;  %513 = vmatpush.msra.mxu0 %v819_v4 }
 0x1a1   :  { %514 = vmatpush.msra.mxu0 %v818_v9 }
 0x1a3   :  { %515 = vmatpush.msra.mxu0 %v817_v13 }
 0x1a4   :  { %v357_v8 = vpop.f32.mrf.mxu2  ;;  %v398_v12 = vpop.f32.mrf.mxu3 }
 0x1a5   :  { %v360_v10 = vadd.f32 %v357_v8, %v318_v7  ;;  %v838_v8 = vld [vmem:[%s1479_s5 + $0x140] sm:$0xff]  ;;  %516 = vmatpush.msra.mxu0 %v816_v17 }
 0x1a6   :  { %625 = vmatpush.msrb.mxu1 %v838_v8 }
 0x1a7   :  { %v401_v14 = vadd.f32 %v398_v12, %v360_v10  ;;  %v498_v10 = vrot.slane %v469_v5, 6  ;;  %v837_v12 = vld [vmem:[%s1479_s5 + $0x138] sm:$0xff]  ;;  %517 = vmatpush.msra.mxu0 %v815_v19 }
 0x1a8   :  { %626 = vmatpush.msrb.mxu1 %v837_v12 }
 0x1a9   :  { %v406_v16 = vadd.f32 %v876_v11, %v401_v14  ;;  %v465_v11 = vld [vmem:[%s1479_s5 + $0x88] sm:$0xff]  ;;  %v499_v14 = vsel %vm493_vm4, %v497_v6, %v498_v10 }
 0x1aa   :  { %580 = vmatpush.msrb.mxu2 %v465_v11  ;;  %832 = vmatmul.msk.f32.vlgmr.msra.gmra.mxu1 %vm414_vm14, %v499_v14 }
 0x1ab   :  { %v407_v18 = vmax.f32 %v406_v16, 0.0  ;;  %v836_v16 = vld [vmem:[%s1479_s5 + $0x130] sm:$0xff] }
 0x1ac   :  { %581 = vmatpush.msrb.mxu2 %v464_v15  ;;  %627 = vmatpush.msrb.mxu1 %v836_v16  ;;  %v651_v38 = vpop.f32.mrf.mxu3 }
 0x1ad   :  { %433 = vrot.lane.b32.xlu1 %v407_v18, %s880_s24  ;;  %v438_v20 = vrot.slane %v407_v18, 4  ;;  %v427_v21 = vrot.slane %v407_v18, 2  ;;  %v835_v18 = vld [vmem:[%s1479_s5 + $0x128] sm:$0xff] }
 0x1ae   :  { %628 = vmatpush.msrb.mxu1 %v835_v18 }
 0x1af   :  { %439 = vrot.lane.b32.xlu2 %v438_v20, %s880_s24  ;;  %v834_v20 = vld [vmem:[%s1479_s5 + $0x120] sm:$0xff] }
 0x1b0   :  { %629 = vmatpush.msrb.mxu1 %v834_v20 }
 0x1b5   :  { %428 = vrot.lane.b32.xlu1 %v427_v21, %s880_s24  ;;  %v814_v21 = vld [vmem:[%s1479_s5 + $0x90] sm:$0xff] }
 0x1b6   :  { %518 = vmatpush.msra.mxu0 %v814_v21 }
 0x1b8   :  { %713 = vmatpush.msrb.mxu0 %v870_v23 }
 0x1ba   :  { %714 = vmatpush.msrb.mxu0 %v869_v24 }
 0x209   :  { %v440_v7 = vpop.permute.xlu2 %439 }
 0x20a   :  { %443 = vst.msk [vmem:[#allocation3 + $0x10] sm:$0x3] %vm442_vm3, %v440_v7 }
 0x211   :  { %v655_v22 = vld [vmem:[#allocation3 + $0x10] sm:$0xf] }
 0x212   :  { %695 = vmatmul.f32.vlgmr.msrb.gmra.mxu3 %v655_v22  ;;  %v468_v29 = vld [vmem:[#allocation3 + $0x10] sm:$0x3] }
 0x213   :  { %v495_v33 = vrot.slane %v468_v29, 6 }
 0x21f   :  { %v434_v25 = vpop.permute.xlu1 %433 }
 0x220   :  { %437 = vst.msk [vmem:[#allocation3] sm:$0xc] %vm436_vm6, %v434_v25 }
 0x227   :  { %v429_v26 = vpop.permute.xlu1 %428  ;;  %v446_v27 = vld [vmem:[#allocation3] sm:$0xf]  ;;  %v540_v36 = vpop.f32.mrf.mxu1 }
 0x228   :  { %432 = vst.msk [vmem:[#allocation3] sm:$0xc0] %vm431_vm7, %v429_v26  ;;  %562 = vmatmul.f32.vlgmr.msra.gmra.mxu2 %v446_v27 }
 0x229   :  { %445 = vst.msk [vmem:[#allocation3] sm:$0x30] %vm444_vm8, %v429_v26 }
 0x22f   :  { %v466_v30 = vld [vmem:[#allocation3] sm:$0xc0] }
 0x230   :  { %833 = vmatmul.msk.f32.vlgmr.msrb.gmra.mxu2 %vm414_vm14, %v447_v28  ;;  %v586_v31 = vld [vmem:[#allocation3] sm:$0x3c]  ;;  %v494_v32 = vrot.slane %v466_v30, 6 }
 0x231   :  { %v609_v42 = vrot.slane %v586_v31, 2 }
 0x232   :  { %v496_v34 = vsel %vm493_vm4, %v494_v32, %v495_v33 }
 0x233   :  { %630 = vmatmul.f32.vlgmr.msrb.gmra.mxu1 %v609_v42  ;;  %519 = vmatmul.f32.vlgmr.msra.gmra.mxu0 %v496_v34 }
 0x23b   :  { %871 = vmatmul.msk.f32.vlgmr.msrb.gmra.mxu0 %vm414_vm14, %v656_v35 }
 0x295   :  { %v696_v47 = vpop.f32.mrf.mxu3 }
 0x2ab   :  { %v563_v37 = vpop.f32.mrf.mxu2 }
 0x2b0   :  { %v520_v39 = vpop.f32.mrf.mxu0  ;;  %v631_v44 = vpop.f32.mrf.mxu1 }
 0x2b1   :  { %v541_v40 = vadd.f32 %v540_v36, %v520_v39  ;;  %v652_v46 = vadd.f32 %v651_v38, %v631_v44 }
 0x2b3   :  { %v564_v41 = vadd.f32 %v563_v37, %v541_v40  ;;  %v583_v43 = vpop.f32.mrf.mxu2 }
 0x2b5   :  { %v584_v45 = vadd.f32 %v583_v43, %v564_v41 }
 0x2b7   :  { %v654_v49 = vadd.f32 %v652_v46, %v584_v45 }
 0x2b8   :  { %v716_v48 = vpop.f32.mrf.mxu0 }
 0x2b9   :  { %v717_v50 = vadd.f32 %v716_v48, %v696_v47 }
 0x2bb   :  { %v719_v52 = vadd.f32 %v717_v50, %v654_v49 }
 0x2bd   :  { %v724_v53 = vadd.f32 %v877_v51, %v719_v52 }
 0x2bf   :  { %v725_v54 = vmax.f32 %v724_v53, 0.0 }
 0x2c1   :  { %727 = vst.msk [vmem:[%s1481_s7] sm:$0xf] %vm726_vm9, %v725_v54 }

</bundles_post_ra>
